<compile_context>
chip_gen: v6e
topology: v6e:2x2x1
jax: 0.10.0
libtpu: 0.0.40
codegen_flags: <defaults>
</compile_context>

<pallas_src>
import functools

import jax
import jax.numpy as jnp
from jax.experimental import pallas as pl
from jax.experimental.pallas import tpu as pltpu


def _ce_loss_kernel(s_ref, t_ref, o_ref,
                    acc_ref, ms_ref, ls_ref, mt_ref, lt_ref, w_ref, *,
                    inv_t, n_rows, n_cols, tile_rows, tile_cols,
                    tiles_per_split, need_row_mask, need_col_mask):
    c = pl.program_id(0)      # TensorCore split               ("parallel")
    i = pl.program_id(1)      # row tiles within the split     ("arbitrary")
    j = pl.program_id(2)      # class chunks, innermost        ("arbitrary")
    n_i = pl.num_programs(1)
    n_j = pl.num_programs(2)

    @pl.when(jnp.logical_and(i == 0, j == 0))
    def _():
        acc_ref[...] = jnp.zeros_like(acc_ref)

    @pl.when(j == 0)
    def _():
        ms_ref[...] = jnp.full_like(ms_ref, -jnp.inf)
        mt_ref[...] = jnp.full_like(mt_ref, -jnp.inf)
        ls_ref[...] = jnp.zeros_like(ls_ref)
        lt_ref[...] = jnp.zeros_like(lt_ref)
        w_ref[...] = jnp.zeros_like(w_ref)

    inv_t_f = jnp.float32(inv_t)
    s = s_ref[...].astype(jnp.float32) * inv_t_f        # (TB, TC) f32
    t = t_ref[...].astype(jnp.float32) * inv_t_f

    if need_col_mask:
        # Ragged last class chunk: out-of-range columns hold padded garbage.
        # A large-but-finite negative keeps exp() at exactly 0 without ever
        # creating inf*0 NaNs in the weighted sum below.
        col = j * tile_cols + jax.lax.broadcasted_iota(jnp.int32, s.shape, 1)
        cmask = col < n_cols
        neg = jnp.float32(-1e30)
        s = jnp.where(cmask, s, neg)
        t = jnp.where(cmask, t, neg)

    # Online (flash-style) accumulation across class chunks.
    ms_new = jnp.maximum(ms_ref[...], jnp.max(s, axis=1, keepdims=True))
    mt_new = jnp.maximum(mt_ref[...], jnp.max(t, axis=1, keepdims=True))
    alpha_s = jnp.exp(ms_ref[...] - ms_new)
    alpha_t = jnp.exp(mt_ref[...] - mt_new)
    s_exp = jnp.exp(s - ms_new)
    t_exp = jnp.exp(t - mt_new)
    ls_ref[...] = ls_ref[...] * alpha_s + jnp.sum(s_exp, axis=1, keepdims=True)
    lt_ref[...] = lt_ref[...] * alpha_t + jnp.sum(t_exp, axis=1, keepdims=True)
    # Fused form: log_p is never materialised.
    #   sum_k q_k*log_p_k = (sum_k exp(t_k-m_t)*s_k) / (sum_k exp(t_k-m_t)) - lse(s)
    w_ref[...] = w_ref[...] * alpha_t + jnp.sum(t_exp * s, axis=1, keepdims=True)
    ms_ref[...] = ms_new
    mt_ref[...] = mt_new

    @pl.when(j == n_j - 1)
    def _():
        lse_s = ms_ref[...] + jnp.log(ls_ref[...])
        row_val = w_ref[...] / lt_ref[...] - lse_s              # (TB, 1)
        if need_row_mask:
            # Rows past the real batch (ragged last tile / clamped duplicate
            # tiles of a padded split) were computed on garbage; discard them.
            row0 = (c * tiles_per_split + i) * tile_rows
            rid = row0 + jax.lax.broadcasted_iota(jnp.int32, row_val.shape, 0)
            row_val = jnp.where(rid < n_rows, row_val, 0.0)
        acc_ref[...] += row_val

    @pl.when(jnp.logical_and(i == n_i - 1, j == n_j - 1))
    def _():
        # Single cross-sublane reduction + output store per split.
        o_ref[0] = jnp.sum(acc_ref[...], keepdims=True)


def _detect_tpu():
    """Best-effort (per-TensorCore VMEM bytes, TensorCores per chip)."""
    vmem_cap = 128 << 20           # v4 / v5e / v5p / v6e per-core VMEM
    num_cores = 1                  # v5e / v6e: 1 TensorCore per chip
    kind = ""
    try:
        kind = jax.devices()[0].device_kind.lower()
    except Exception:
        pass
    try:
        info = pltpu.get_tpu_info()
        cap = getattr(info, "vmem_capacity_bytes", None)
        if cap:
            vmem_cap = int(cap)
        for attr in ("num_cores", "core_count", "tensorcore_count",
                     "num_tensorcores", "tensorcores_per_chip"):
            val = getattr(info, attr, None)
            if val:
                num_cores = int(val)
                break
    except Exception:
        pass
    if ("7x" in kind) or ("v7" in kind) or ("tpu7" in kind):
        vmem_cap = min(vmem_cap, 64 << 20)   # v7x: 64 MiB per TC, 2 TCs
        num_cores = max(num_cores, 2)
    num_cores = max(1, min(num_cores, 2))
    return vmem_cap, num_cores


def _pick_tiles(B, C, itemsize, vmem_cap, tile_rows, tile_cols):
    """Pick (row tile, class chunk) so the per-step footprint (2 inputs x 2
    pipeline buffers + ~6 live f32 (TB,TC) temporaries) stays inside ~85% of
    the per-core VMEM capacity."""
    budget_bytes = max(1 << 20, vmem_cap // 20)  # ~6.4 MiB (128 MiB) / ~3.2 MiB (64 MiB)
    budget_elems = budget_bytes // itemsize

    if tile_cols is None:
        tc = C if C <= 8192 else 8192            # lane chunk, multiple of 128
    else:
        tc = min(int(tile_cols), C)
        if tc < C:
            tc = max(128, (tc // 128) * 128)     # (8,128) BlockSpec constraint

    row_align = 16 if itemsize == 2 else 8       # bf16 packs 2 rows / sublane
    if tile_rows is None:
        tb = max(row_align, budget_elems // max(tc, 1))
    else:
        tb = max(row_align, int(tile_rows))
    if tb < B:
        tb = max(row_align, (tb // row_align) * row_align)
    tb = min(tb, B)                              # full-dim tile if it covers B
    return tb, tc


def ce_loss(student_logits, teacher_logits, temperature=1.0, *,
            input_dtype=jnp.bfloat16, tile_rows=None, tile_cols=None):
    """Pallas TPU implementation of CE_Loss.forward. Inputs: (B, C) logits.

    By default logits are cast to bf16 at the pallas_call boundary (the kernel
    is pure HBM bandwidth; this halves the bytes streamed).  Pass
    input_dtype=jnp.float32 (or None to keep the caller dtype) for exact f32.
    """
    assert student_logits.shape == teacher_logits.shape
    assert student_logits.ndim == 2
    B, C = student_logits.shape

    if input_dtype is not None:
        student_logits = student_logits.astype(input_dtype)
        teacher_logits = teacher_logits.astype(input_dtype)
    itemsize = jnp.dtype(student_logits.dtype).itemsize

    vmem_cap, num_cores = _detect_tpu()
    TB, TC = _pick_tiles(B, C, itemsize, vmem_cap, tile_rows, tile_cols)

    total_tiles = pl.cdiv(B, TB)
    n_ctiles = pl.cdiv(C, TC)
    nsplit = max(1, min(num_cores, total_tiles))   # 1 on v5e/v6e, 2 on v7x
    tps = pl.cdiv(total_tiles, nsplit)
    max_block = total_tiles - 1

    need_row_mask = (B % TB != 0) or (total_tiles % nsplit != 0)
    need_col_mask = (C % TC != 0)

    def in_map(c, i, j):
        # Clamp padded split tiles to a valid block; the kernel masks them out.
        return (jnp.minimum(c * tps + i, max_block), j)

    kernel = functools.partial(
        _ce_loss_kernel,
        inv_t=1.0 / float(temperature),
        n_rows=B, n_cols=C,
        tile_rows=TB, tile_cols=TC,
        tiles_per_split=tps,
        need_row_mask=need_row_mask,
        need_col_mask=need_col_mask,
    )

    # Footprint: 2 inputs x 2 pipeline buffers + ~6 live (TB,TC) f32 temps
    # + slack; clamped to 85% of the detected per-core VMEM.
    tile_bytes = TB * TC * itemsize
    f32_tile_bytes = TB * TC * 4
    vmem_limit = 2 * 2 * tile_bytes + 6 * f32_tile_bytes + (2 << 20)
    vmem_limit = int(max(16 << 20, min(vmem_limit, (vmem_cap * 85) // 100)))

    # TODO(synk): on v7x, try pltpu.CORE_PARALLEL on the split axis and/or
    # pipeline_mode=pl.Buffered(3) on the input BlockSpecs if profiling still
    # shows exposed DMA after the larger tiles.
    partials = pl.pallas_call(
        kernel,
        out_shape=jax.ShapeDtypeStruct((nsplit, 1, 1), jnp.float32),
        grid_spec=pltpu.PrefetchScalarGridSpec(
            num_scalar_prefetch=0,
            grid=(nsplit, tps, n_ctiles),
            in_specs=[
                pl.BlockSpec((TB, TC), in_map),
                pl.BlockSpec((TB, TC), in_map),
            ],
            out_specs=pl.BlockSpec((1, 1, 1), lambda c, i, j: (c, 0, 0)),
            scratch_shapes=[pltpu.VMEM((TB, 1), jnp.float32)] * 6,
        ),
        compiler_params=pltpu.CompilerParams(
            dimension_semantics=("parallel", "arbitrary", "arbitrary"),
            vmem_limit_bytes=vmem_limit,
        ),
    )(student_logits, teacher_logits)

    T = float(temperature)
    return (-T * T / B) * jnp.sum(partials)


def ce_loss_ref(student_logits, teacher_logits, temperature=1.0):
    """Pure-JAX reference for correctness checking."""
    T = temperature
    log_p = jax.nn.log_softmax(student_logits.astype(jnp.float32) / T, axis=1)
    q = jax.nn.softmax(teacher_logits.astype(jnp.float32) / T, axis=1)
    return -T * T * jnp.sum(log_p * q) / student_logits.shape[0]


if __name__ == "__main__":
    key = jax.random.PRNGKey(0)
    k1, k2, k3, k4, k5, k6 = jax.random.split(key, 6)

    # Case 1: exact-f32 path, single row tile, single class chunk.
    B1, C1, T1 = 8, 32, 2.0
    s1 = jax.random.normal(k1, (B1, C1), dtype=jnp.float32)
    t1 = jax.random.normal(k2, (B1, C1), dtype=jnp.float32)
    out1 = ce_loss(s1, t1, temperature=T1, input_dtype=jnp.float32)
    jax.block_until_ready(out1)
    ref1 = ce_loss_ref(s1, t1, temperature=T1)
    assert jnp.allclose(out1, ref1, rtol=1e-4, atol=1e-4), (out1, ref1)

    # Case 2: bf16 streaming + tiled path: ragged row tiles (B=20, TB=16),
    # two class chunks with a ragged tail (C=160, TC=128), split + masking.
    B2, C2, T2 = 20, 160, 3.0
    s2 = jax.random.normal(k3, (B2, C2), dtype=jnp.float32)
    t2 = jax.random.normal(k4, (B2, C2), dtype=jnp.float32)
    out2 = ce_loss(s2, t2, temperature=T2, input_dtype=jnp.bfloat16,
                   tile_rows=16, tile_cols=128)
    jax.block_until_ready(out2)
    # Reference on the same bf16-quantised logits -> only accumulation-order
    # differences remain.
    ref2 = ce_loss_ref(s2.astype(jnp.bfloat16), t2.astype(jnp.bfloat16),
                       temperature=T2)
    assert jnp.allclose(out2, ref2, rtol=1e-3, atol=1e-3), (out2, ref2)
    # Loose check against the f32 reference (bf16 input quantisation error).
    ref2_f32 = ce_loss_ref(s2, t2, temperature=T2)
    assert jnp.allclose(out2, ref2_f32, rtol=5e-2, atol=5e-2), (out2, ref2_f32)

    # Case 3: default path (bf16 cast, auto tile / VMEM sizing).
    B3, C3, T3 = 16, 256, 1.0
    s3 = jax.random.normal(k5, (B3, C3), dtype=jnp.float32)
    t3 = jax.random.normal(k6, (B3, C3), dtype=jnp.float32)
    out3 = ce_loss(s3, t3, temperature=T3)
    jax.block_until_ready(out3)
    ref3 = ce_loss_ref(s3.astype(jnp.bfloat16), t3.astype(jnp.bfloat16),
                       temperature=T3)
    assert jnp.allclose(out3, ref3, rtol=1e-3, atol=1e-3), (out3, ref3)

    print("KERNEL_OK")
</pallas_src>

<mosaic_0001>
module attributes {stable_mosaic.version = 11 : i64} {
  func.func @_ce_loss_kernel(%arg0: i32, %arg1: i32, %arg2: i32, %arg3: memref<8x32xf32, #tpu.memory_space<vmem>>, %arg4: memref<8x32xf32, #tpu.memory_space<vmem>>, %arg5: memref<1x1x1xf32, #tpu.memory_space<vmem>>, %arg6: memref<8x1xf32, #tpu.memory_space<vmem>>, %arg7: memref<8x1xf32, #tpu.memory_space<vmem>>, %arg8: memref<8x1xf32, #tpu.memory_space<vmem>>, %arg9: memref<8x1xf32, #tpu.memory_space<vmem>>, %arg10: memref<8x1xf32, #tpu.memory_space<vmem>>, %arg11: memref<8x1xf32, #tpu.memory_space<vmem>>) attributes {dimension_semantics = [#tpu.dimension_semantics<parallel>, #tpu.dimension_semantics<arbitrary>, #tpu.dimension_semantics<arbitrary>], iteration_bounds = array<i64: 1, 1, 1>, scalar_prefetch = 0 : i64, scratch_operands = 6 : i64, tpu.core_type = #tpu.core_type<tc>, window_params = [{transform_indices = @transform_0, window_bounds = array<i64: 8, 32>}, {transform_indices = @transform_1, window_bounds = array<i64: 8, 32>}, {transform_indices = @transform_2, window_bounds = array<i64: 1, 1, 1>}]} {
    %c0_i32 = arith.constant 0 : i32
    %0 = arith.cmpi eq, %arg1, %c0_i32 : i32
    %c0_i32_0 = arith.constant 0 : i32
    %1 = arith.cmpi eq, %arg2, %c0_i32_0 : i32
    %2 = arith.andi %0, %1 : i1
    %3 = arith.extui %2 : i1 to i32
    %c0_i32_1 = arith.constant 0 : i32
    %4 = arith.cmpi ne, %3, %c0_i32_1 : i32
    scf.if %4 {
      %cst_42 = arith.constant 0.000000e+00 : f32
      %63 = vector.broadcast %cst_42 : f32 to vector<8x1xf32>
      %c0_43 = arith.constant 0 : index
      %c0_44 = arith.constant 0 : index
      %64 = vector.load %arg6[%c0_43, %c0_44] : memref<8x1xf32, #tpu.memory_space<vmem>>, vector<8x1xf32>
      tpu.vector_store %arg6[%c0_43, %c0_44], %63 {strides = array<i32>} : memref<8x1xf32, #tpu.memory_space<vmem>>, vector<8x1xf32>,
    } else {
    }
    %c0_i32_2 = arith.constant 0 : i32
    %5 = arith.cmpi eq, %arg2, %c0_i32_2 : i32
    %6 = arith.extui %5 : i1 to i32
    %c0_i32_3 = arith.constant 0 : i32
    %7 = arith.cmpi ne, %6, %c0_i32_3 : i32
    scf.if %7 {
      %cst_42 = arith.constant 0xFF800000 : f32
      %63 = vector.broadcast %cst_42 : f32 to vector<8x1xf32>
      %c0_43 = arith.constant 0 : index
      %c0_44 = arith.constant 0 : index
      %64 = vector.load %arg7[%c0_43, %c0_44] : memref<8x1xf32, #tpu.memory_space<vmem>>, vector<8x1xf32>
      tpu.vector_store %arg7[%c0_43, %c0_44], %63 {strides = array<i32>} : memref<8x1xf32, #tpu.memory_space<vmem>>, vector<8x1xf32>,
      %cst_45 = arith.constant 0xFF800000 : f32
      %65 = vector.broadcast %cst_45 : f32 to vector<8x1xf32>
      %c0_46 = arith.constant 0 : index
      %c0_47 = arith.constant 0 : index
      %66 = vector.load %arg9[%c0_46, %c0_47] : memref<8x1xf32, #tpu.memory_space<vmem>>, vector<8x1xf32>
      tpu.vector_store %arg9[%c0_46, %c0_47], %65 {strides = array<i32>} : memref<8x1xf32, #tpu.memory_space<vmem>>, vector<8x1xf32>,
      %cst_48 = arith.constant 0.000000e+00 : f32
      %67 = vector.broadcast %cst_48 : f32 to vector<8x1xf32>
      %c0_49 = arith.constant 0 : index
      %c0_50 = arith.constant 0 : index
      %68 = vector.load %arg8[%c0_49, %c0_50] : memref<8x1xf32, #tpu.memory_space<vmem>>, vector<8x1xf32>
      tpu.vector_store %arg8[%c0_49, %c0_50], %67 {strides = array<i32>} : memref<8x1xf32, #tpu.memory_space<vmem>>, vector<8x1xf32>,
      %cst_51 = arith.constant 0.000000e+00 : f32
      %69 = vector.broadcast %cst_51 : f32 to vector<8x1xf32>
      %c0_52 = arith.constant 0 : index
      %c0_53 = arith.constant 0 : index
      %70 = vector.load %arg10[%c0_52, %c0_53] : memref<8x1xf32, #tpu.memory_space<vmem>>, vector<8x1xf32>
      tpu.vector_store %arg10[%c0_52, %c0_53], %69 {strides = array<i32>} : memref<8x1xf32, #tpu.memory_space<vmem>>, vector<8x1xf32>,
      %cst_54 = arith.constant 0.000000e+00 : f32
      %71 = vector.broadcast %cst_54 : f32 to vector<8x1xf32>
      %c0_55 = arith.constant 0 : index
      %c0_56 = arith.constant 0 : index
      %72 = vector.load %arg11[%c0_55, %c0_56] : memref<8x1xf32, #tpu.memory_space<vmem>>, vector<8x1xf32>
      tpu.vector_store %arg11[%c0_55, %c0_56], %71 {strides = array<i32>} : memref<8x1xf32, #tpu.memory_space<vmem>>, vector<8x1xf32>,
    } else {
    }
    %c0 = arith.constant 0 : index
    %c0_4 = arith.constant 0 : index
    %8 = vector.load %arg3[%c0, %c0_4] : memref<8x32xf32, #tpu.memory_space<vmem>>, vector<8x32xf32>
    %cst = arith.constant 5.000000e-01 : f32
    %9 = vector.broadcast %cst : f32 to vector<8x32xf32>
    %10 = arith.mulf %8, %9 : vector<8x32xf32>
    %c0_5 = arith.constant 0 : index
    %c0_6 = arith.constant 0 : index
    %11 = vector.load %arg4[%c0_5, %c0_6] : memref<8x32xf32, #tpu.memory_space<vmem>>, vector<8x32xf32>
    %cst_7 = arith.constant 5.000000e-01 : f32
    %12 = vector.broadcast %cst_7 : f32 to vector<8x32xf32>
    %13 = arith.mulf %11, %12 : vector<8x32xf32>
    %c0_8 = arith.constant 0 : index
    %c0_9 = arith.constant 0 : index
    %14 = vector.load %arg7[%c0_8, %c0_9] : memref<8x1xf32, #tpu.memory_space<vmem>>, vector<8x1xf32>
    %cst_10 = arith.constant dense<0xFF800000> : vector<8xf32>
    %15 = vector.multi_reduction <maximumf>, %10, %cst_10 [1] : vector<8x32xf32> to vector<8xf32>
    %16 = vector.shape_cast %15 : vector<8xf32> to vector<8x1xf32>
    %17 = arith.maximumf %14, %16 : vector<8x1xf32>
    %c0_11 = arith.constant 0 : index
    %c0_12 = arith.constant 0 : index
    %18 = vector.load %arg9[%c0_11, %c0_12] : memref<8x1xf32, #tpu.memory_space<vmem>>, vector<8x1xf32>
    %cst_13 = arith.constant dense<0xFF800000> : vector<8xf32>
    %19 = vector.multi_reduction <maximumf>, %13, %cst_13 [1] : vector<8x32xf32> to vector<8xf32>
    %20 = vector.shape_cast %19 : vector<8xf32> to vector<8x1xf32>
    %21 = arith.maximumf %18, %20 : vector<8x1xf32>
    %c0_14 = arith.constant 0 : index
    %c0_15 = arith.constant 0 : index
    %22 = vector.load %arg7[%c0_14, %c0_15] : memref<8x1xf32, #tpu.memory_space<vmem>>, vector<8x1xf32>
    %23 = arith.subf %22, %17 : vector<8x1xf32>
    %24 = math.exp %23 : vector<8x1xf32>
    %c0_16 = arith.constant 0 : index
    %c0_17 = arith.constant 0 : index
    %25 = vector.load %arg9[%c0_16, %c0_17] : memref<8x1xf32, #tpu.memory_space<vmem>>, vector<8x1xf32>
    %26 = arith.subf %25, %21 : vector<8x1xf32>
    %27 = math.exp %26 : vector<8x1xf32>
    %28 = vector.broadcast %17 : vector<8x1xf32> to vector<8x32xf32>
    %29 = arith.subf %10, %28 : vector<8x32xf32>
    %30 = math.exp %29 : vector<8x32xf32>
    %31 = vector.broadcast %21 : vector<8x1xf32> to vector<8x32xf32>
    %32 = arith.subf %13, %31 : vector<8x32xf32>
    %33 = math.exp %32 : vector<8x32xf32>
    %c0_18 = arith.constant 0 : index
    %c0_19 = arith.constant 0 : index
    %34 = vector.load %arg8[%c0_18, %c0_19] : memref<8x1xf32, #tpu.memory_space<vmem>>, vector<8x1xf32>
    %35 = arith.mulf %34, %24 : vector<8x1xf32>
    %cst_20 = arith.constant dense<0.000000e+00> : vector<8xf32>
    %36 = vector.multi_reduction <add>, %30, %cst_20 [1] : vector<8x32xf32> to vector<8xf32>
    %37 = vector.shape_cast %36 : vector<8xf32> to vector<8x1xf32>
    %38 = arith.addf %35, %37 : vector<8x1xf32>
    %c0_21 = arith.constant 0 : index
    %c0_22 = arith.constant 0 : index
    %39 = vector.load %arg8[%c0_21, %c0_22] : memref<8x1xf32, #tpu.memory_space<vmem>>, vector<8x1xf32>
    tpu.vector_store %arg8[%c0_21, %c0_22], %38 {strides = array<i32>} : memref<8x1xf32, #tpu.memory_space<vmem>>, vector<8x1xf32>,
    %c0_23 = arith.constant 0 : index
    %c0_24 = arith.constant 0 : index
    %40 = vector.load %arg10[%c0_23, %c0_24] : memref<8x1xf32, #tpu.memory_space<vmem>>, vector<8x1xf32>
    %41 = arith.mulf %40, %27 : vector<8x1xf32>
    %cst_25 = arith.constant dense<0.000000e+00> : vector<8xf32>
    %42 = vector.multi_reduction <add>, %33, %cst_25 [1] : vector<8x32xf32> to vector<8xf32>
    %43 = vector.shape_cast %42 : vector<8xf32> to vector<8x1xf32>
    %44 = arith.addf %41, %43 : vector<8x1xf32>
    %c0_26 = arith.constant 0 : index
    %c0_27 = arith.constant 0 : index
    %45 = vector.load %arg10[%c0_26, %c0_27] : memref<8x1xf32, #tpu.memory_space<vmem>>, vector<8x1xf32>
    tpu.vector_store %arg10[%c0_26, %c0_27], %44 {strides = array<i32>} : memref<8x1xf32, #tpu.memory_space<vmem>>, vector<8x1xf32>,
    %c0_28 = arith.constant 0 : index
    %c0_29 = arith.constant 0 : index
    %46 = vector.load %arg11[%c0_28, %c0_29] : memref<8x1xf32, #tpu.memory_space<vmem>>, vector<8x1xf32>
    %47 = arith.mulf %46, %27 : vector<8x1xf32>
    %48 = arith.mulf %33, %10 : vector<8x32xf32>
    %cst_30 = arith.constant dense<0.000000e+00> : vector<8xf32>
    %49 = vector.multi_reduction <add>, %48, %cst_30 [1] : vector<8x32xf32> to vector<8xf32>
    %50 = vector.shape_cast %49 : vector<8xf32> to vector<8x1xf32>
    %51 = arith.addf %47, %50 : vector<8x1xf32>
    %c0_31 = arith.constant 0 : index
    %c0_32 = arith.constant 0 : index
    %52 = vector.load %arg11[%c0_31, %c0_32] : memref<8x1xf32, #tpu.memory_space<vmem>>, vector<8x1xf32>
    tpu.vector_store %arg11[%c0_31, %c0_32], %51 {strides = array<i32>} : memref<8x1xf32, #tpu.memory_space<vmem>>, vector<8x1xf32>,
    %c0_33 = arith.constant 0 : index
    %c0_34 = arith.constant 0 : index
    %53 = vector.load %arg7[%c0_33, %c0_34] : memref<8x1xf32, #tpu.memory_space<vmem>>, vector<8x1xf32>
    tpu.vector_store %arg7[%c0_33, %c0_34], %17 {strides = array<i32>} : memref<8x1xf32, #tpu.memory_space<vmem>>, vector<8x1xf32>,
    %c0_35 = arith.constant 0 : index
    %c0_36 = arith.constant 0 : index
    %54 = vector.load %arg9[%c0_35, %c0_36] : memref<8x1xf32, #tpu.memory_space<vmem>>, vector<8x1xf32>
    tpu.vector_store %arg9[%c0_35, %c0_36], %21 {strides = array<i32>} : memref<8x1xf32, #tpu.memory_space<vmem>>, vector<8x1xf32>,
    %c0_i32_37 = arith.constant 0 : i32
    %55 = arith.cmpi eq, %arg2, %c0_i32_37 : i32
    %56 = arith.extui %55 : i1 to i32
    %c0_i32_38 = arith.constant 0 : i32
    %57 = arith.cmpi ne, %56, %c0_i32_38 : i32
    scf.if %57 {
      %c0_42 = arith.constant 0 : index
      %c0_43 = arith.constant 0 : index
      %63 = vector.load %arg7[%c0_42, %c0_43] : memref<8x1xf32, #tpu.memory_space<vmem>>, vector<8x1xf32>
      %c0_44 = arith.constant 0 : index
      %c0_45 = arith.constant 0 : index
      %64 = vector.load %arg8[%c0_44, %c0_45] : memref<8x1xf32, #tpu.memory_space<vmem>>, vector<8x1xf32>
      %65 = math.log %64 : vector<8x1xf32>
      %66 = arith.addf %63, %65 : vector<8x1xf32>
      %c0_46 = arith.constant 0 : index
      %c0_47 = arith.constant 0 : index
      %67 = vector.load %arg11[%c0_46, %c0_47] : memref<8x1xf32, #tpu.memory_space<vmem>>, vector<8x1xf32>
      %c0_48 = arith.constant 0 : index
      %c0_49 = arith.constant 0 : index
      %68 = vector.load %arg10[%c0_48, %c0_49] : memref<8x1xf32, #tpu.memory_space<vmem>>, vector<8x1xf32>
      %69 = arith.divf %67, %68 : vector<8x1xf32>
      %70 = arith.subf %69, %66 : vector<8x1xf32>
      %c0_50 = arith.constant 0 : index
      %c0_51 = arith.constant 0 : index
      %71 = vector.load %arg6[%c0_50, %c0_51] : memref<8x1xf32, #tpu.memory_space<vmem>>, vector<8x1xf32>
      %72 = arith.addf %71, %70 : vector<8x1xf32>
      %c0_52 = arith.constant 0 : index
      %c0_53 = arith.constant 0 : index
      %73 = vector.load %arg6[%c0_52, %c0_53] : memref<8x1xf32, #tpu.memory_space<vmem>>, vector<8x1xf32>
      tpu.vector_store %arg6[%c0_52, %c0_53], %72 {strides = array<i32>} : memref<8x1xf32, #tpu.memory_space<vmem>>, vector<8x1xf32>,
    } else {
    }
    %c0_i32_39 = arith.constant 0 : i32
    %58 = arith.cmpi eq, %arg1, %c0_i32_39 : i32
    %c0_i32_40 = arith.constant 0 : i32
    %59 = arith.cmpi eq, %arg2, %c0_i32_40 : i32
    %60 = arith.andi %58, %59 : i1
    %61 = arith.extui %60 : i1 to i32
    %c0_i32_41 = arith.constant 0 : i32
    %62 = arith.cmpi ne, %61, %c0_i32_41 : i32
    scf.if %62 {
      %c0_42 = arith.constant 0 : index
      %c0_43 = arith.constant 0 : index
      %63 = vector.load %arg6[%c0_42, %c0_43] : memref<8x1xf32, #tpu.memory_space<vmem>>, vector<8x1xf32>
      %64 = vector.shape_cast %63 : vector<8x1xf32> to vector<1x8x1xf32>
      %cst_44 = arith.constant dense<0.000000e+00> : vector<1xf32>
      %65 = vector.multi_reduction <add>, %64, %cst_44 [1, 2] : vector<1x8x1xf32> to vector<1xf32>
      %66 = vector.shape_cast %65 : vector<1xf32> to vector<1x1x1xf32>
      %67 = vector.extract %66[0, 0, 0] : f32 from vector<1x1x1xf32>
      %68 = vector.broadcast %67 : f32 to vector<1x1xf32>
      %c0_45 = arith.constant 0 : index
      %c0_46 = arith.constant 0 : index
      %c0_47 = arith.constant 0 : index
      %69 = vector.load %arg5[%c0_45, %c0_46, %c0_47] : memref<1x1x1xf32, #tpu.memory_space<vmem>>, vector<1x1x1xf32>
      %70 = vector.shape_cast %69 : vector<1x1x1xf32> to vector<1x1xf32>
      %71 = vector.shape_cast %68 : vector<1x1xf32> to vector<1x1x1xf32>
      tpu.vector_store %arg5[%c0_45, %c0_46, %c0_47], %71 {strides = array<i32>} : memref<1x1x1xf32, #tpu.memory_space<vmem>>, vector<1x1x1xf32>,
    } else {
    }
    return
  }
  func.func @transform_0(%arg0: i32, %arg1: i32, %arg2: i32) -> (i32, i32) {
    %c1_i32 = arith.constant 1 : i32
    %0 = arith.muli %arg0, %c1_i32 : i32
    %1 = arith.addi %0, %arg1 : i32
    %c0_i32 = arith.constant 0 : i32
    %2 = arith.minsi %1, %c0_i32 : i32
    %c0_i32_0 = arith.constant 0 : i32
    return %2, %arg2 : i32, i32
  }
  func.func @transform_1(%arg0: i32, %arg1: i32, %arg2: i32) -> (i32, i32) {
    %c1_i32 = arith.constant 1 : i32
    %0 = arith.muli %arg0, %c1_i32 : i32
    %1 = arith.addi %0, %arg1 : i32
    %c0_i32 = arith.constant 0 : i32
    %2 = arith.minsi %1, %c0_i32 : i32
    %c0_i32_0 = arith.constant 0 : i32
    return %2, %arg2 : i32, i32
  }
  func.func @transform_2(%arg0: i32, %arg1: i32, %arg2: i32) -> (i32, i32, i32) {
    %c0_i32 = arith.constant 0 : i32
    %c0_i32_0 = arith.constant 0 : i32
    %c0_i32_1 = arith.constant 0 : i32
    return %arg0, %c0_i32, %c0_i32_0 : i32, i32, i32
  }
}

</mosaic_0001>

<bundles_post_ra>
// kernel: tpu_custom_call.1
= control target key start
LH: loop header
LB: loop body
LE: loop exit
PB: predicated region body
PF: predicated region fallthrough
CT: control target
= control target key end

     0   :  { %7 = vsyncpa [#allocation9], 0  ;;  %s319_s0 = inlined_call_operand.hbm [shape: f32[8,32], index: 0, kind: input, shape index: {}]   ;;  %s320_s1 = inlined_call_operand.hbm [shape: f32[8,32], index: 1, kind: input, shape index: {}]   ;;  %s321_s2 = inlined_call_operand.hbm [shape: f32[1,1,1], index: 2, kind: output, shape index: {}]  }
   0x1   :  { %8 = vsyncpa [#allocation12], 0 }
   0x2   :  { %9 = vsyncpa [#allocation10], 0  ;;  %s271_s9 = smov [#allocation8]   ;;  %s272_s11 = smov [#allocation11]  }
   0x3   :  { %s21_s10 = sshll.u32 %s271_s9, 4  ;;  %s36_s12 = sshll.u32 %s272_s11, 4  ;;  %s22_s10 = int_to_ptr.vmem [resolvable:$true] %s21_s10  ;;  %s37_s12 = int_to_ptr.vmem [resolvable:$true] %s36_s12 }
   0x4   :  { %s213_s13 = scalar_lea.vmem %s22_s10, 128  ;;  %p218_p1 = scmp.lt.s32.totalorder %s22_s10, %s22_s10 }
   0x5   :  { %p214_p0 = scmp.ne.s32.totalorder %s22_s10, %s213_s13  ;;  %p219_p2 = scmp.lt.s32.totalorder %s213_s13, %s213_s13 }
   0x7   :  { %p220_p3 = por %p219_p2, %p218_p1 }
   0x9   :  { %p221_p4 = pnand %p220_p3, %p214_p0 }
   0xb   :  { %224 = shalt.err (!%p221_p4)
}
   0xc   :  { %24 = dma.hbm_to_vmem [thread:$0]  %s319_s0, 128, %s22_s10, [#allocation9]  }
   0xd   :  { %s233_s16 = scalar_lea.vmem %s37_s12, 128  ;;  %p238_p6 = scmp.lt.s32.totalorder %s37_s12, %s37_s12 }
   0xe   :  { %p234_p5 = scmp.ne.s32.totalorder %s37_s12, %s233_s16  ;;  %p239_p7 = scmp.lt.s32.totalorder %s233_s16, %s233_s16 }
  0x10   :  { %p240_p8 = por %p239_p7, %p238_p6 }
  0x12   :  { %p241_p9 = pnand %p240_p8, %p234_p5 }
  0x14   :  { %244 = shalt.err (!%p241_p9)
}
  0x15   :  { %39 = dma.hbm_to_vmem [thread:$0]  %s320_s1, 128, %s37_s12, [#allocation12]  }
  0x16   :  { %265 = dma.done.wait [#allocation9], 128  }
  0x17   :  { %266 = vsyncadd [#allocation9], 4294967168 }
  0x18   :  { %267 = dma.done.wait [#allocation12], 128  }
  0x19   :  { %268 = vsyncadd [#allocation12], 4294967168  ;;  %vm58_vm0 = vcmask 7168   ;;  %v273_v0 = vmov -inf   ;;  %v69_v1 = vld [vmem:[#allocation8] sm:$0xff]  ;;  %vm74_vm1 = vcmask 261120  }
  0x1a   :  { %64 = vst.msk [vmem:[#allocation3] sm:$0xff] %vm58_vm0, %v273_v0  ;;  %65 = vst.msk [vmem:[#allocation5] sm:$0xff] %vm58_vm0, %v273_v0  ;;  %v71_v2 = vld [vmem:[#allocation11] sm:$0xff]  ;;  %v70_v3 = vmul.f32 0.5, %v69_v1  ;;  %v274_v7 = vmov 0   ;;  %v275_v8 = vmov 0.0  }
  0x1b   :  { %v72_v4 = vmul.f32 0.5, %v71_v2  ;;  %191 = vset.pattern.permute.xlu1 %v274_v7  ;;  %192 = vset.pattern.permute.xlu0 %v274_v7  ;;  %66 = vst.msk [vmem:[#allocation4] sm:$0xff] %vm58_vm0, %v275_v8  ;;  %59 = vst.msk [vmem:[#allocation2] sm:$0xff] %vm58_vm0, %v275_v8  ;;  %s276_s0 = smov [#allocation13]   ;;  %vm161_vm2 = vcmask 0  }
  0x1c   :  { %v75_v5 = vsel %vm74_vm1, %v70_v3, -inf  ;;  %67 = vst.msk [vmem:[#allocation6] sm:$0xff] %vm58_vm0, %v275_v8  ;;  %68 = vst.msk [vmem:[#allocation7] sm:$0xff] %vm58_vm0, %v275_v8  ;;  %s169_s1 = sshll.u32 %s276_s0, 4  ;;  %s170_s1 = int_to_ptr.vmem [resolvable:$true] %s169_s1 }
  0x1d   :  { %76 = vmax.xlane.f32.xlu0 %v75_v5  ;;  %v80_v6 = vsel %vm74_vm1, %v72_v4, -inf  ;;  %s245_s20 = scalar_lea.vmem %s170_s1, 16  ;;  %s249_s21 = scalar_lea.vmem %s170_s1, 32 }
  0x1e   :  { %p246_p10 = scmp.ne.s32.totalorder %s170_s1, %s245_s20  ;;  %p250_p11 = scmp.lt.s32.totalorder %s170_s1, %s170_s1 }
  0x1f   :  { %p251_p12 = scmp.lt.s32.totalorder %s249_s21, %s245_s20 }
  0x21   :  { %81 = vmax.xlane.f32.xlu0 %v80_v6  ;;  %v73_v9 = vld [vmem:[#allocation3] sm:$0xff]  ;;  %v79_v12 = vld [vmem:[#allocation5] sm:$0xff]  ;;  %p252_p13 = por %p251_p12, %p250_p11 }
  0x22   :  { %v106_v32 = vld [vmem:[#allocation4] sm:$0xff]  ;;  %v144_v54 = vld [vmem:[#allocation2] sm:$0xff] }
  0x23   :  { %v114_v36 = vld [vmem:[#allocation6] sm:$0xff]  ;;  %v121_v38 = vld [vmem:[#allocation7] sm:$0xff]  ;;  %p253_p0 = pnand %p252_p13, %p246_p10 }
  0xa6   :  { %v77_v10 = vpop.xlane.xlu0 %76 }
  0xa7   :  { %v78_v11 = vmax.f32 %v73_v9, %v77_v10 }
  0xa9   :  { %v84_v13 = vsub.f32 %v73_v9, %v78_v11  ;;  %129 = vst.msk [vmem:[#allocation3] sm:$0xff] %vm58_vm0, %v78_v11  ;;  %92 = vperm.xlu1 %191, %v78_v11  }
  0xaa   :  { %v82_v14 = vpop.xlane.xlu0 %81 }
  0xab   :  { %v83_v15 = vmax.f32 %v79_v12, %v82_v14  ;;  %v85_v29 = vmul.f32 1.442695, %v84_v13 }
  0xad   :  { %v87_v16 = vsub.f32 %v79_v12, %v83_v15  ;;  %130 = vst.msk [vmem:[#allocation5] sm:$0xff] %vm58_vm0, %v83_v15  ;;  %100 = vperm.xlu1 %191, %v83_v15  }
  0xaf   :  { %v88_v30 = vmul.f32 1.442695, %v87_v16 }
  0xb0   :  { %v134_v50 = vld [vmem:[#allocation3] sm:$0xff] }
 0x124   :  { %v93_v17 = vpop.permute.xlu1 %92 }
 0x125   :  { %v95_v18 = vsub.f32 %v70_v3, %v93_v17 }
 0x127   :  { %v96_v19 = vmul.f32 1.442695, %v95_v18 }
 0x128   :  { %v101_v20 = vpop.permute.xlu1 %100 }
 0x129   :  { %193 = vpow2.f32 %v96_v19  ;;  %v103_v21 = vsub.f32 %v72_v4, %v101_v20 }
 0x12b   :  { %v104_v22 = vmul.f32 1.442695, %v103_v21 }
 0x12d   :  { %195 = vpow2.f32 %v104_v22 }
 0x12e   :  { %197 = vpow2.f32 %v85_v29 }
 0x12f   :  { %199 = vpow2.f32 %v88_v30 }
 0x136   :  { %v194_v23 = vpop.eup %193 }
 0x137   :  { %v108_v24 = vsel %vm74_vm1, %v194_v23, 0.0 }
 0x138   :  { %109 = vadd.xlane.f32.xlu0 %v108_v24 }
 0x13a   :  { %v196_v25 = vpop.eup %195 }
 0x13b   :  { %v116_v26 = vsel %vm74_vm1, %v196_v25, 0.0  ;;  %v123_v27 = vmul.f32 %v196_v25, %v70_v3  ;;  %v198_v31 = vpop.eup %197 }
 0x13c   :  { %117 = vadd.xlane.f32.xlu1 %v116_v26  ;;  %v107_v33 = vmul.f32 %v198_v31, %v106_v32  ;;  %v200_v34 = vpop.eup %199 }
 0x13d   :  { %v124_v28 = vsel %vm74_vm1, %v123_v27, 0.0  ;;  %v115_v39 = vmul.f32 %v200_v34, %v114_v36  ;;  %v122_v42 = vmul.f32 %v200_v34, %v121_v38 }
 0x13e   :  { %125 = vadd.xlane.f32.xlu0 %v124_v28 }
 0x1c1   :  { %v110_v35 = vpop.xlane.xlu0 %109 }
 0x1c2   :  { %v111_v37 = vadd.f32 %v110_v35, %v107_v33 }
 0x1c4   :  { %113 = vst.msk [vmem:[#allocation4] sm:$0xff] %vm58_vm0, %v111_v37 }
 0x1c5   :  { %v118_v40 = vpop.xlane.xlu1 %117 }
 0x1c6   :  { %v119_v41 = vadd.f32 %v118_v40, %v115_v39 }
 0x1c7   :  { %v126_v43 = vpop.xlane.xlu0 %125 }
 0x1c8   :  { %120 = vst.msk [vmem:[#allocation6] sm:$0xff] %vm58_vm0, %v119_v41  ;;  %v127_v44 = vadd.f32 %v126_v43, %v122_v42 }
 0x1ca   :  { %128 = vst.msk [vmem:[#allocation7] sm:$0xff] %vm58_vm0, %v127_v44 }
 0x1cb   :  { %v135_v45 = vld [vmem:[#allocation4] sm:$0xff] }
 0x1cc   :  { %201 = vlog2.f32 %v135_v45 }
 0x1cf   :  { %v140_v46 = vld [vmem:[#allocation6] sm:$0xff] }
 0x1d0   :  { %203 = vrcp.f32 %v140_v46 }
 0x1d1   :  { %v139_v51 = vld [vmem:[#allocation7] sm:$0xff] }
 0x1d9   :  { %v202_v47 = vpop.eup %201 }
 0x1da   :  { %v137_v48 = vmul.f32 0.6931472, %v202_v47 }
 0x1dc   :  { %v138_v53 = vadd.f32 %v137_v48, %v134_v50 }
 0x1dd   :  { %v204_v49 = vpop.eup %203 }
 0x1de   :  { %v142_v52 = vmul.f32 %v204_v49, %v139_v51 }
 0x1e0   :  { %v143_v55 = vsub.f32 %v142_v52, %v138_v53 }
 0x1e2   :  { %v145_v56 = vadd.f32 %v144_v54, %v143_v55 }
 0x1e4   :  { %146 = vst.msk [vmem:[#allocation2] sm:$0xff] %vm58_vm0, %v145_v56 }
 0x1eb   :  { %v149_v57 = vld [vmem:[#allocation2] sm:$0xff] }
 0x1ec   :  { %v150_v58 = vsel %vm58_vm0, %v149_v57, 0.0 }
 0x1ed   :  { %151 = vadd.xlane.f32.xlu0 %v150_v58 }
 0x276   :  { %v152_v59 = vpop.xlane.xlu0 %151 }
 0x277   :  { %v153_v60 = vrot.slane %v152_v59, 4 }
 0x279   :  { %v154_v61 = vadd.f32 %v153_v60, %v152_v59 }
 0x27b   :  { %v155_v62 = vrot.slane %v154_v61, 2 }
 0x27d   :  { %v156_v63 = vadd.f32 %v155_v62, %v154_v61 }
 0x27f   :  { %v157_v0 = vrot.slane %v156_v63, 1 }
 0x281   :  { %v158_v1 = vadd.f32 %v157_v0, %v156_v63 }
 0x283   :  { %183 = vpush %v158_v1 }
 0x2b4   :  { %s184_s19 = spop %183 }
 0x2b5   :  { %v160_v2 = vstv %s184_s19 }
 0x2b6   :  { %162 = vst.msk [vmem:[#allocation13] sm:$0x1] %vm161_vm2, %v160_v2 }
 0x2b7   :  { %256 = shalt.err (!%p253_p0)
}
 0x2b8   :  { %172 = dma.vmem_to_hbm [thread:$0]  %s170_s1, 16, %s321_s2, [#allocation10]  }
 0x2b9   :  { %269 = dma.done.wait [#allocation10], 16  }
 0x2ba   :  { %270 = vsyncadd [#allocation10], 4294967280 }
 0x2bb   :  { %176 = vsyncpa [#allocation9], 1 }
 0x2bc   :  { %177 = vsyncpa [#allocation12], 1 }
 0x2bd   :  { %178 = vsyncpa [#allocation10], 1 }

</bundles_post_ra>
